<compile_context>
chip_gen: v7x
topology: tpu7x:2x2x1
jax: 0.10.0
libtpu: 0.0.40
codegen_flags: <defaults>
</compile_context>

<pallas_src>
import jax
import jax.numpy as jnp
from jax import lax
from jax.experimental import pallas as pl
from jax.experimental.pallas import tpu as pltpu


def lstm_cell_kernel(x_ref, hx_ref, wx_ref, wh_ref, b_ref, cx_ref,
                     hy_ref, cy_ref):
    """Fused LSTM cell: two accumulating MXU matmuls + gate math in VMEM.

    x_ref : (B, I)    matmul operand dtype (bf16 or f32)
    hx_ref: (B, H)    matmul operand dtype
    wx_ref: (I, 4H)   matmul operand dtype, gate columns [i | f | o | g]
    wh_ref: (H, 4H)   matmul operand dtype, gate columns [i | f | o | g]
    b_ref : (1, 4H)   float32, gate columns [i | f | o | g]
    cx_ref: (B, H)    float32
    hy_ref: (B, H)    output dtype
    cy_ref: (B, H)    output dtype
    """
    # Two MXU pushes, f32 accumulation, bias as a VPU broadcast add.
    gates = (jnp.dot(x_ref[...], wx_ref[...],
                     preferred_element_type=jnp.float32)
             + jnp.dot(hx_ref[...], wh_ref[...],
                       preferred_element_type=jnp.float32)
             + b_ref[...])                                   # (B, 4H) f32

    H = cx_ref.shape[1]

    # Sigmoid gates are contiguous in the first 3H columns, cellgate in the
    # last H columns -> one EUP pass per nonlinearity, no wasted lanes.
    sig = jax.nn.sigmoid(gates[:, :3 * H])                   # (B, 3H)
    cellgate = jnp.tanh(gates[:, 3 * H:])                    # (B, H)

    ingate = sig[:, 0 * H:1 * H]
    forgetgate = sig[:, 1 * H:2 * H]
    outgate = sig[:, 2 * H:3 * H]

    cy = forgetgate * cx_ref[...] + ingate * cellgate
    hy = outgate * jnp.tanh(cy)

    hy_ref[...] = hy.astype(hy_ref.dtype)
    cy_ref[...] = cy.astype(cy_ref.dtype)


def _permute_gate_rows(w):
    """Reorder the 4H gate rows from [i, f, g, o] to [i, f, o, g]."""
    i, f, g, o = jnp.split(w, 4, axis=0)
    return jnp.concatenate([i, f, o, g], axis=0)


def prepare_lstm_weights(w_ih, w_hh, b_ih, b_hh, *,
                         operand_dtype=jnp.bfloat16):
    """One-time (hoisted) weight prep: permute gates, transpose, cast.

    w_ih: (4H, I), w_hh: (4H, H), b_ih/b_hh: (4H,)  -- PyTorch layout.
    Returns (w_x: (I,4H), w_h: (H,4H), b: (1,4H) f32) with gate columns in
    [ingate | forgetgate | outgate | cellgate] order.
    """
    w_x = jnp.transpose(_permute_gate_rows(w_ih)).astype(operand_dtype)
    w_h = jnp.transpose(_permute_gate_rows(w_hh)).astype(operand_dtype)
    b = _permute_gate_rows((b_ih + b_hh)[:, None])[:, 0]
    b = b[None, :].astype(jnp.float32)
    return w_x, w_h, b


def lstm_cell(x, hx, cx, params):
    """Pallas LSTM cell.

    x: (B, I), hx/cx: (B, H); params = prepare_lstm_weights(...).
    Returns (hy, (hy, cy)) matching the PyTorch module.
    """
    w_x, w_h, b = params
    B, I = x.shape
    H = hx.shape[1]
    G = 4 * H
    operand_dtype = w_x.dtype
    out_dtype = x.dtype

    x_op = x.astype(operand_dtype)
    hx_op = hx.astype(operand_dtype)
    cx_f32 = cx.astype(jnp.float32)

    full = lambda shape: pl.BlockSpec(shape, lambda: (0,) * len(shape),
                                      memory_space=pltpu.VMEM)

    itemsize = jnp.dtype(operand_dtype).itemsize
    out_itemsize = jnp.dtype(out_dtype).itemsize
    cost = pl.CostEstimate(
        flops=2 * B * (I + H) * G + 10 * B * H,
        transcendentals=B * (3 * H + 2 * H),
        bytes_accessed=((B * I + B * H + I * G + H * G) * itemsize
                        + (G + B * H) * 4
                        + 2 * B * H * out_itemsize),
    )

    hy, cy = pl.pallas_call(
        lstm_cell_kernel,
        out_shape=(jax.ShapeDtypeStruct((B, H), out_dtype),
                   jax.ShapeDtypeStruct((B, H), out_dtype)),
        in_specs=[
            full((B, I)),     # x
            full((B, H)),     # hx
            full((I, G)),     # W_ih^T (permuted)
            full((H, G)),     # W_hh^T (permuted)
            full((1, G)),     # combined bias (f32)
            full((B, H)),     # cx (f32)
        ],
        out_specs=(full((B, H)), full((B, H))),
        cost_estimate=cost,
    )(x_op, hx_op, w_x, w_h, b, cx_f32)

    return hy, (hy, cy)


def lstm_cell_ref(x, hx, cx, w_ih, w_hh, b_ih, b_hh,
                  operand_dtype=jnp.float32):
    """Pure-JAX reference mirroring the PyTorch forward.

    operand_dtype applies the same quantization the kernel's matmul operands
    see (bf16 round-trip), with f32 accumulation and an f32 bias, so bf16-mode
    comparisons are apples-to-apples.
    """
    q = lambda a: a.astype(operand_dtype).astype(jnp.float32)
    gates = (jnp.dot(q(x), q(jnp.transpose(w_ih)),
                     precision=lax.Precision.HIGHEST)
             + jnp.dot(q(hx), q(jnp.transpose(w_hh)),
                       precision=lax.Precision.HIGHEST)
             + (b_ih + b_hh).astype(jnp.float32))
    H = hx.shape[1]
    i = jax.nn.sigmoid(gates[:, 0 * H:1 * H])
    f = jax.nn.sigmoid(gates[:, 1 * H:2 * H])
    g = jnp.tanh(gates[:, 2 * H:3 * H])
    o = jax.nn.sigmoid(gates[:, 3 * H:4 * H])
    cy = f * cx.astype(jnp.float32) + i * g
    hy = o * jnp.tanh(cy)
    return hy, (hy, cy)


if __name__ == "__main__":
    batch = 8
    input_size = 32
    hidden_size = 32
    G = 4 * hidden_size

    key = jax.random.PRNGKey(0)
    ks = jax.random.split(key, 7)

    # Deterministic synthetic parameters (shapes from the module __init__).
    w_ih = jax.random.normal(ks[0], (G, input_size), dtype=jnp.float32)
    w_hh = jax.random.normal(ks[1], (G, hidden_size), dtype=jnp.float32)
    b_ih = jax.random.normal(ks[2], (G,), dtype=jnp.float32)
    b_hh = jax.random.normal(ks[3], (G,), dtype=jnp.float32)

    x = jax.random.normal(ks[4], (batch, input_size), dtype=jnp.float32)
    hx = jax.random.normal(ks[5], (batch, hidden_size), dtype=jnp.float32)
    cx = jax.random.normal(ks[6], (batch, hidden_size), dtype=jnp.float32)

    # --- bf16-operand mode (production path on v5e/v6e/v7x MXU) ---
    params_bf16 = prepare_lstm_weights(w_ih, w_hh, b_ih, b_hh,
                                       operand_dtype=jnp.bfloat16)
    hy_bf, (_, cy_bf) = jax.block_until_ready(
        lstm_cell(x, hx, cx, params_bf16))
    hy_ref_bf, (_, cy_ref_bf) = lstm_cell_ref(
        x, hx, cx, w_ih, w_hh, b_ih, b_hh, operand_dtype=jnp.bfloat16)
    assert jnp.allclose(hy_bf, hy_ref_bf, atol=2e-3, rtol=2e-3)
    assert jnp.allclose(cy_bf, cy_ref_bf, atol=2e-3, rtol=2e-3)

    # --- f32-operand mode (tight check against the PyTorch-equivalent math) ---
    params_f32 = prepare_lstm_weights(w_ih, w_hh, b_ih, b_hh,
                                      operand_dtype=jnp.float32)
    hy_f32, (_, cy_f32) = jax.block_until_ready(
        lstm_cell(x, hx, cx, params_f32))
    hy_ref, (_, cy_ref) = lstm_cell_ref(
        x, hx, cx, w_ih, w_hh, b_ih, b_hh, operand_dtype=jnp.float32)
    assert jnp.allclose(hy_f32, hy_ref, atol=1e-4, rtol=1e-4)
    assert jnp.allclose(cy_f32, cy_ref, atol=1e-4, rtol=1e-4)

    print("KERNEL_OK")
</pallas_src>

<mosaic_0001>
module attributes {stable_mosaic.version = 11 : i64} {
  func.func @lstm_cell_kernel(%arg0: memref<8x32xbf16, #tpu.memory_space<vmem>>, %arg1: memref<8x32xbf16, #tpu.memory_space<vmem>>, %arg2: memref<32x128xbf16, #tpu.memory_space<vmem>>, %arg3: memref<32x128xbf16, #tpu.memory_space<vmem>>, %arg4: memref<1x128xf32, #tpu.memory_space<vmem>>, %arg5: memref<8x32xf32, #tpu.memory_space<vmem>>, %arg6: memref<8x32xf32, #tpu.memory_space<vmem>>, %arg7: memref<8x32xf32, #tpu.memory_space<vmem>>) attributes {dimension_semantics = [], scalar_prefetch = 0 : i64, scratch_operands = 0 : i64, tpu.core_type = #tpu.core_type<tc>} {
    %c0 = arith.constant 0 : index
    %c0_0 = arith.constant 0 : index
    %0 = vector.load %arg0[%c0, %c0_0] : memref<8x32xbf16, #tpu.memory_space<vmem>>, vector<8x32xbf16>
    %c0_1 = arith.constant 0 : index
    %c0_2 = arith.constant 0 : index
    %1 = vector.load %arg2[%c0_1, %c0_2] : memref<32x128xbf16, #tpu.memory_space<vmem>>, vector<32x128xbf16>
    %cst = arith.constant dense<0.000000e+00> : vector<8x128xf32>
    %2 = tpu.matmul %0, %1, %cst {dimension_numbers = #tpu.dot_dimension_numbers<[1], [0], [0], [1], [0, 0, 1, 1], [], []>} : vector<8x32xbf16>, vector<32x128xbf16>, vector<8x128xf32> -> vector<8x128xf32>
    %c0_3 = arith.constant 0 : index
    %c0_4 = arith.constant 0 : index
    %3 = vector.load %arg1[%c0_3, %c0_4] : memref<8x32xbf16, #tpu.memory_space<vmem>>, vector<8x32xbf16>
    %c0_5 = arith.constant 0 : index
    %c0_6 = arith.constant 0 : index
    %4 = vector.load %arg3[%c0_5, %c0_6] : memref<32x128xbf16, #tpu.memory_space<vmem>>, vector<32x128xbf16>
    %cst_7 = arith.constant dense<0.000000e+00> : vector<8x128xf32>
    %5 = tpu.matmul %3, %4, %cst_7 {dimension_numbers = #tpu.dot_dimension_numbers<[1], [0], [0], [1], [0, 0, 1, 1], [], []>} : vector<8x32xbf16>, vector<32x128xbf16>, vector<8x128xf32> -> vector<8x128xf32>
    %6 = arith.addf %2, %5 : vector<8x128xf32>
    %c0_8 = arith.constant 0 : index
    %c0_9 = arith.constant 0 : index
    %7 = vector.load %arg4[%c0_8, %c0_9] : memref<1x128xf32, #tpu.memory_space<vmem>>, vector<1x128xf32>
    %8 = vector.broadcast %7 : vector<1x128xf32> to vector<8x128xf32>
    %9 = arith.addf %6, %8 : vector<8x128xf32>
    %10 = vector.extract_strided_slice %9 {offsets = [0, 0], sizes = [8, 96], strides = [1, 1]} : vector<8x128xf32> to vector<8x96xf32>
    %11 = arith.negf %10 : vector<8x96xf32>
    %12 = math.exp %11 : vector<8x96xf32>
    %cst_10 = arith.constant 1.000000e+00 : f32
    %13 = vector.broadcast %cst_10 : f32 to vector<8x96xf32>
    %14 = arith.addf %13, %12 : vector<8x96xf32>
    %15 = arith.divf %13, %14 : vector<8x96xf32>
    %16 = vector.extract_strided_slice %9 {offsets = [0, 96], sizes = [8, 32], strides = [1, 1]} : vector<8x128xf32> to vector<8x32xf32>
    %17 = math.tanh %16 : vector<8x32xf32>
    %18 = vector.extract_strided_slice %15 {offsets = [0, 0], sizes = [8, 32], strides = [1, 1]} : vector<8x96xf32> to vector<8x32xf32>
    %19 = vector.extract_strided_slice %15 {offsets = [0, 32], sizes = [8, 32], strides = [1, 1]} : vector<8x96xf32> to vector<8x32xf32>
    %20 = vector.extract_strided_slice %15 {offsets = [0, 64], sizes = [8, 32], strides = [1, 1]} : vector<8x96xf32> to vector<8x32xf32>
    %c0_11 = arith.constant 0 : index
    %c0_12 = arith.constant 0 : index
    %21 = vector.load %arg5[%c0_11, %c0_12] : memref<8x32xf32, #tpu.memory_space<vmem>>, vector<8x32xf32>
    %22 = arith.mulf %19, %21 : vector<8x32xf32>
    %23 = arith.mulf %18, %17 : vector<8x32xf32>
    %24 = arith.addf %22, %23 : vector<8x32xf32>
    %25 = math.tanh %24 : vector<8x32xf32>
    %26 = arith.mulf %20, %25 : vector<8x32xf32>
    %c0_13 = arith.constant 0 : index
    %c0_14 = arith.constant 0 : index
    %27 = vector.load %arg6[%c0_13, %c0_14] : memref<8x32xf32, #tpu.memory_space<vmem>>, vector<8x32xf32>
    tpu.vector_store %arg6[%c0_13, %c0_14], %26 {strides = array<i32>} : memref<8x32xf32, #tpu.memory_space<vmem>>, vector<8x32xf32>,
    %c0_15 = arith.constant 0 : index
    %c0_16 = arith.constant 0 : index
    %28 = vector.load %arg7[%c0_15, %c0_16] : memref<8x32xf32, #tpu.memory_space<vmem>>, vector<8x32xf32>
    tpu.vector_store %arg7[%c0_15, %c0_16], %24 {strides = array<i32>} : memref<8x32xf32, #tpu.memory_space<vmem>>, vector<8x32xf32>,
    return
  }
}

</mosaic_0001>

<bundles_post_ra>
// kernel: tpu_custom_call.1
= control target key start
LH: loop header
LB: loop body
LE: loop exit
PB: predicated region body
PF: predicated region fallthrough
CT: control target
= control target key end

     0   :  { %13 = vsyncpa [#allocation3], 0  ;;  %s613_s0 = inlined_call_operand.hbm [shape: bf16[8,32], index: 0, kind: input, shape index: {}]   ;;  %s614_s1 = inlined_call_operand.hbm [shape: bf16[8,32], index: 1, kind: input, shape index: {}]   ;;  %s615_s2 = inlined_call_operand.hbm [shape: bf16[32,128], index: 2, kind: input, shape index: {}]   ;;  %s616_s3 = inlined_call_operand.hbm [shape: bf16[32,128], index: 3, kind: input, shape index: {}]   ;;  %s617_s4 = inlined_call_operand.vmem [shape: f32[1,128], index: 4, kind: input, shape index: {}]   ;;  %s618_s5 = inlined_call_operand.vmem [shape: f32[8,32], index: 5, kind: input, shape index: {}]   ;;  %s619_s6 = inlined_call_operand.hbm [shape: f32[8,32], index: 6, kind: output, shape index: {0}]   ;;  %s620_s7 = inlined_call_operand.hbm [shape: f32[8,32], index: 7, kind: output, shape index: {1}]  }
   0x1   :  { %14 = vsyncpa [#allocation6], 0 }
   0x2   :  { %15 = vsyncpa [#allocation9], 0 }
   0x3   :  { %16 = vsyncpa [#allocation4], 0 }
   0x4   :  { %17 = vsyncpa [#allocation12], 0  ;;  %s474_s24 = smov [#allocation5]   ;;  %s475_s26 = smov [#allocation2]  }
   0x5   :  { %s34_s25 = sshll.u32 %s474_s24, 4  ;;  %s24_s27 = sshll.u32 %s475_s26, 4  ;;  %s35_s25 = int_to_ptr.vmem [resolvable:$true] %s34_s25  ;;  %s25_s27 = int_to_ptr.vmem [resolvable:$true] %s24_s27 }
   0x6   :  { %s332_s30 = scalar_lea.hbm %s614_s1, 64 }
   0x7   :  { %p333_p0 = scmp.ne.s32.totalorder %s614_s1, %s332_s30  ;;  %p336_p1 = scmp.lt.u32.totalorder %s332_s30, %s614_s1 }
   0x9   :  { %p338_p2 = pnand %p336_p1, %p333_p0 }
   0xb   :  { %341 = shalt.err (!%p338_p2)
}
   0xc   :  { %s342_s12 = scalar_lea.vmem %s35_s25, 64  ;;  %p347_p4 = scmp.lt.s32.totalorder %s35_s25, %s35_s25 }
   0xd   :  { %p343_p3 = scmp.ne.s32.totalorder %s35_s25, %s342_s12  ;;  %p348_p5 = scmp.lt.s32.totalorder %s342_s12, %s342_s12 }
   0xf   :  { %p349_p6 = por %p348_p5, %p347_p4 }
  0x11   :  { %p350_p7 = pnand %p349_p6, %p343_p3 }
  0x13   :  { %353 = shalt.err (!%p350_p7)
}
  0x14   :  { %37 = dma.hbm_to_vmem [thread:$0]  %s614_s1, 64, %s35_s25, [#allocation6]  }
  0x15   :  { %s354_s17 = scalar_lea.hbm %s613_s0, 64 }
  0x16   :  { %p355_p8 = scmp.ne.s32.totalorder %s613_s0, %s354_s17  ;;  %p358_p9 = scmp.lt.u32.totalorder %s354_s17, %s613_s0 }
  0x18   :  { %p360_p10 = pnand %p358_p9, %p355_p8 }
  0x1a   :  { %363 = shalt.err (!%p360_p10)
}
  0x1b   :  { %s364_s22 = scalar_lea.vmem %s25_s27, 64  ;;  %p369_p12 = scmp.lt.s32.totalorder %s25_s27, %s25_s27 }
  0x1c   :  { %p365_p11 = scmp.ne.s32.totalorder %s25_s27, %s364_s22  ;;  %p370_p13 = scmp.lt.s32.totalorder %s364_s22, %s364_s22 }
  0x1e   :  { %p371_p0 = por %p370_p13, %p369_p12 }
  0x20   :  { %p372_p1 = pnand %p371_p0, %p365_p11 }
  0x22   :  { %375 = shalt.err (!%p372_p1)
}
  0x23   :  { %27 = dma.hbm_to_vmem [thread:$0]  %s613_s0, 64, %s25_s27, [#allocation3]  }
  0x24   :  { %s476_s24 = smov [#allocation7]   ;;  %s376_s29 = scalar_lea.hbm %s615_s2, 256 }
  0x25   :  { %s43_s25 = sshll.u32 %s476_s24, 4  ;;  %p377_p2 = scmp.ne.s32.totalorder %s615_s2, %s376_s29  ;;  %s44_s25 = int_to_ptr.vmem [resolvable:$true] %s43_s25 }
  0x26   :  { %p380_p3 = scmp.lt.u32.totalorder %s376_s29, %s615_s2 }
  0x28   :  { %p382_p4 = pnand %p380_p3, %p377_p2 }
  0x2a   :  { %385 = shalt.err (!%p382_p4)
}
  0x2b   :  { %s386_s11 = scalar_lea.vmem %s44_s25, 256  ;;  %p391_p6 = scmp.lt.s32.totalorder %s44_s25, %s44_s25 }
  0x2c   :  { %p387_p5 = scmp.ne.s32.totalorder %s44_s25, %s386_s11  ;;  %p392_p7 = scmp.lt.s32.totalorder %s386_s11, %s386_s11 }
  0x2e   :  { %p393_p8 = por %p392_p7, %p391_p6 }
  0x30   :  { %p394_p9 = pnand %p393_p8, %p387_p5 }
  0x32   :  { %397 = shalt.err (!%p394_p9)
}
  0x33   :  { %s477_s0 = smov 64   ;;  %s478_s27 = smov 4  }
  0x34   :  { %49 = dma.hbm_to_vmem [thread:$0]  %s615_s2, 256, %s44_s25, [#allocation6], %s477_s0, %s477_s0, %s478_s27  }
  0x35   :  { %s479_s14 = smov [#allocation8]   ;;  %s398_s18 = scalar_lea.hbm %s616_s3, 256 }
  0x36   :  { %s55_s15 = sshll.u32 %s479_s14, 4  ;;  %p399_p10 = scmp.ne.s32.totalorder %s616_s3, %s398_s18  ;;  %s56_s15 = int_to_ptr.vmem [resolvable:$true] %s55_s15 }
  0x37   :  { %p402_p11 = scmp.lt.u32.totalorder %s398_s18, %s616_s3 }
  0x39   :  { %p404_p12 = pnand %p402_p11, %p399_p10 }
  0x3b   :  { %407 = shalt.err (!%p404_p12)
}
  0x3c   :  { %s408_s1 = scalar_lea.vmem %s56_s15, 256  ;;  %p413_p0 = scmp.lt.s32.totalorder %s56_s15, %s56_s15 }
  0x3d   :  { %p409_p13 = scmp.ne.s32.totalorder %s56_s15, %s408_s1  ;;  %p414_p1 = scmp.lt.s32.totalorder %s408_s1, %s408_s1 }
  0x3f   :  { %p415_p2 = por %p414_p1, %p413_p0 }
  0x41   :  { %p416_p3 = pnand %p415_p2, %p409_p13 }
  0x43   :  { %419 = shalt.err (!%p416_p3)
}
  0x44   :  { %61 = dma.hbm_to_vmem [thread:$0]  %s616_s3, 256, %s56_s15, [#allocation9], %s477_s0, %s477_s0, %s478_s27  }
  0x45   :  { %464 = dma.done.wait [#allocation3], 64  }
  0x46   :  { %465 = vsyncadd [#allocation3], 4294967232 }
  0x47   :  { %466 = dma.done.wait [#allocation6], 320  }
  0x48   :  { %467 = vsyncadd [#allocation6], 4294966976 }
  0x49   :  { %468 = dma.done.wait [#allocation9], 256  }
  0x4a   :  { %469 = vsyncadd [#allocation9], 4294967040  ;;  %v480_v0 = vmov 0.0   ;;  %vm481_vm0 = vmmov 0   ;;  %v320_v1 = vld [vmem:[#allocation8] sm:$0xff]   ;;  %v321_v2 = vld [vmem:[#allocation7] sm:$0xff]  }
  0x4b   :  { %292 = vmatprep.subr.bf16.mxu0 %v480_v0  ;;  %300 = vmatprep.subr.bf16.mxu1 %v480_v0  ;;  %v322_v3 = vld [vmem:[#allocation8 + $0x8] sm:$0xff]   ;;  %v323_v4 = vld [vmem:[#allocation7 + $0x8] sm:$0xff]   ;;  %vm101_vm1 = vcmask 261120   ;;  %v284_v9 = vld [vmem:[%s617_s4] ss:$0 sm:$0xff]  ;;  %s482_s25 = smov 32  }
  0x4c   :  { %296 = vmatprep.mubr.msk.bf16.mxu0 %vm481_vm0, %v480_v0  ;;  %304 = vmatprep.mubr.msk.bf16.mxu1 %vm481_vm0, %v480_v0  ;;  %v84_v5 = vld [vmem:[#allocation5] sm:$0xf]  ;;  %v79_v6 = vld [vmem:[#allocation2] sm:$0xf]  ;;  %v215_v19 = vld [vmem:[%s618_s5] sm:$0xff]  ;;  %s483_s4 = smov 96  }
  0x4d   :  { %293 = vmatpush3.bf16.msra.mxu0 %v320_v1  ;;  %301 = vmatpush3.bf16.msra.mxu1 %v321_v2  ;;  %s484_s5 = smov [#allocation11]  }
  0x4e   :  { %294 = vmatprep.subr.bf16.mxu0 %v480_v0  ;;  %302 = vmatprep.subr.bf16.mxu1 %v480_v0  ;;  %s263_s29 = sshll.u32 %s484_s5, 4  ;;  %s264_s29 = int_to_ptr.vmem [resolvable:$true] %s263_s29 }
  0x4f   :  { %s420_s30 = scalar_lea.vmem %s264_s29, 128  ;;  %p425_p5 = scmp.lt.s32.totalorder %s264_s29, %s264_s29 }
  0x50   :  { %p421_p4 = scmp.ne.s32.totalorder %s264_s29, %s420_s30  ;;  %p426_p6 = scmp.lt.s32.totalorder %s420_s30, %s420_s30 }
  0x51   :  { %295 = vmatpush3.bf16.msra.mxu0 %v322_v3  ;;  %303 = vmatpush3.bf16.msra.mxu1 %v323_v4 }
  0x52   :  { %p427_p7 = por %p426_p6, %p425_p5 }
  0x54   :  { %297 = vmatmul.mubr.msk.bf16.vlgmr.msra.gmra.mrb[0].mxu0 %vm101_vm1, %v84_v5  ;;  %305 = vmatmul.mubr.msk.bf16.vlgmr.msra.gmra.mrb[0].mxu1 %vm101_vm1, %v79_v6  ;;  %p428_p8 = pnand %p427_p7, %p421_p4 }
 0x127   :  { %v139_v7 = vpop.f32.mrb[0].mxu0  ;;  %v194_v8 = vpop.f32.mrb[0].mxu1 }
 0x128   :  { %v298_v10 = vpop.f32.mrb[1].mxu0  ;;  %v195_v11 = vadd.f32 %v194_v8, %v139_v7  ;;  %v306_v12 = vpop.f32.mrb[1].mxu1 }
 0x129   :  { %v142_v13 = vpop.f32.mrb[2].mxu0  ;;  %v197_v14 = vpop.f32.mrb[2].mxu1 }
 0x12a   :  { %v299_v15 = vpop.f32.mrb[3].mxu0  ;;  %v207_v16 = vadd.f32 %v284_v9, %v195_v11  ;;  %v307_v17 = vpop.f32.mrb[3].mxu1 }
 0x12c   :  { %324 = vtanh.f32 %v207_v16  ;;  %v285_v20 = vmul.f32 -1.442695, %v207_v16 }
 0x12e   :  { %326 = vpow2.f32 %v285_v20 }
 0x136   :  { %v325_v18 = vpop.eup %324 }
 0x137   :  { %222 = vrot.lane.b32.xlu0 %v325_v18, %s482_s25 }
 0x138   :  { %v327_v21 = vpop.eup %326 }
 0x139   :  { %v211_v22 = vadd.f32 1.0, %v327_v21 }
 0x13b   :  { %217 = vrot.lane.b32.xlu0 %v215_v19, %s482_s25  ;;  %328 = vrcp.f32 %v211_v22 }
 0x145   :  { %v329_v23 = vpop.eup %328 }
 0x1a9   :  { %v223_v24 = vpop.permute.xlu0 %222 }
 0x1aa   :  { %v225_v25 = vmul.f32 %v329_v23, %v223_v24 }
 0x1ac   :  { %227 = vrot.lane.b32.xlu1 %v225_v25, %s482_s25 }
 0x1ad   :  { %v218_v26 = vpop.permute.xlu0 %217 }
 0x1ae   :  { %v220_v27 = vmul.f32 %v329_v23, %v218_v26 }
 0x21e   :  { %v228_v28 = vpop.permute.xlu1 %227 }
 0x21f   :  { %v230_v29 = vadd.f32 %v228_v28, %v220_v27 }
 0x221   :  { %330 = vtanh.f32 %v230_v29 }
 0x22b   :  { %v331_v30 = vpop.eup %330 }
 0x22c   :  { %233 = vrot.lane.b32.xlu1 %v331_v30, %s482_s25 }
 0x230   :  { %243 = vrot.lane.b32.xlu1 %v230_v29, %s483_s4 }
 0x29e   :  { %v234_v31 = vpop.permute.xlu1 %233 }
 0x29f   :  { %v236_v32 = vmul.f32 %v329_v23, %v234_v31 }
 0x2a1   :  { %238 = vrot.lane.b32.xlu0 %v236_v32, %s477_s0 }
 0x2a2   :  { %v244_v33 = vpop.permute.xlu1 %243 }
 0x2a3   :  { %246 = vst.msk [vmem:[#allocation11] sm:$0xff] %vm101_vm1, %v244_v33 }
 0x2a4   :  { %431 = shalt.err (!%p428_p8)
}
 0x2a5   :  { %s432_s10 = scalar_lea.hbm %s620_s7, 128 }
 0x2a6   :  { %p433_p9 = scmp.ne.s32.totalorder %s620_s7, %s432_s10  ;;  %p436_p10 = scmp.lt.u32.totalorder %s432_s10, %s620_s7 }
 0x2a8   :  { %p438_p11 = pnand %p436_p10, %p433_p9 }
 0x2aa   :  { %441 = shalt.err (!%p438_p11)
}
 0x2ab   :  { %266 = dma.vmem_to_hbm [thread:$0]  %s264_s29, 128, %s620_s7, [#allocation12]  }
 0x2ac   :  { %s485_s15 = smov [#allocation10]  }
 0x2ad   :  { %s253_s16 = sshll.u32 %s485_s15, 4  ;;  %s254_s16 = int_to_ptr.vmem [resolvable:$true] %s253_s16 }
 0x2ae   :  { %s442_s17 = scalar_lea.vmem %s254_s16, 128  ;;  %p447_p13 = scmp.lt.s32.totalorder %s254_s16, %s254_s16 }
 0x2af   :  { %p443_p12 = scmp.ne.s32.totalorder %s254_s16, %s442_s17  ;;  %p448_p0 = scmp.lt.s32.totalorder %s442_s17, %s442_s17 }
 0x2b1   :  { %p449_p1 = por %p448_p0, %p447_p13 }
 0x2b3   :  { %p450_p2 = pnand %p449_p1, %p443_p12 }
 0x313   :  { %v239_v34 = vpop.permute.xlu0 %238 }
 0x314   :  { %241 = vst.msk [vmem:[#allocation10] sm:$0xff] %vm101_vm1, %v239_v34 }
 0x315   :  { %453 = shalt.err (!%p450_p2)
}
 0x316   :  { %s454_s20 = scalar_lea.hbm %s619_s6, 128 }
 0x317   :  { %p455_p3 = scmp.ne.s32.totalorder %s619_s6, %s454_s20  ;;  %p458_p4 = scmp.lt.u32.totalorder %s454_s20, %s619_s6 }
 0x319   :  { %p460_p5 = pnand %p458_p4, %p455_p3 }
 0x31b   :  { %463 = shalt.err (!%p460_p5)
}
 0x31c   :  { %256 = dma.vmem_to_hbm [thread:$0]  %s254_s16, 128, %s619_s6, [#allocation4]  }
 0x31d   :  { %470 = dma.done.wait [#allocation4], 128  }
 0x31e   :  { %471 = vsyncadd [#allocation4], 4294967168 }
 0x31f   :  { %472 = dma.done.wait [#allocation12], 128  }
 0x320   :  { %473 = vsyncadd [#allocation12], 4294967168 }
 0x321   :  { %273 = vsyncpa [#allocation3], 1 }
 0x322   :  { %274 = vsyncpa [#allocation6], 1 }
 0x323   :  { %275 = vsyncpa [#allocation9], 1 }
 0x324   :  { %276 = vsyncpa [#allocation4], 1 }
 0x325   :  { %277 = vsyncpa [#allocation12], 1 }

</bundles_post_ra>
